<compile_context>
chip_gen: v5e
topology: v5e:2x2
jax: 0.10.0
libtpu: 0.0.40
codegen_flags: <defaults>
</compile_context>

<pallas_src>
import jax
import jax.numpy as jnp
from jax.experimental import pallas as pl
from jax.experimental.pallas import tpu as pltpu


def _round_up(v, m):
    return ((v + m - 1) // m) * m


def encoder_block(x, w, b, gamma, beta, *, kernel_size=4, stride=2, padding=1, eps=1e-5):
    """LeakyReLU(0.2) -> Conv2d(4,2,1) -> BatchNorm2d (training-mode batch statistics).

    x: (N, C_in, H, W) f32; w: (C_out, C_in, 4, 4) f32; b/gamma/beta: (C_out,) f32.
    `b` is accepted for interface parity but unused: BN's batch-mean subtraction cancels
    a per-channel conv bias in the forward output (running stats are not modeled here).
    """
    del b
    assert kernel_size == 4 and stride == 2 and padding == 1, "specialised to k=4, s=2, p=1"
    N, C_in, H, W = x.shape
    C_out = w.shape[0]
    assert H % 2 == 0 and W % 2 == 0
    OH, OW = H // 2, W // 2
    R, S = OH + 1, OW + 1          # space-to-depth grid of the padded input
    M = N * OH * OW                # BN population size (valid output positions)

    LO = _round_up(R * S, 128)     # lane-dense flattened (r, s) output grid
    LI = LO + 128                  # zero tail so shifted windows never run off the end

    # ---- O(|x|) JAX-side restructure (NOT im2col: no 4x duplication in HBM) --------------------
    # xsf[n, (di*2+dj)*C_in + c, r*S + s] = x_pad[n, c, 2r+di, 2s+dj]
    xp = jnp.pad(x, ((0, 0), (0, 0), (padding, padding), (padding, padding)))
    xs = xp.reshape(N, C_in, R, 2, S, 2).transpose(0, 3, 5, 1, 2, 4)     # (n,di,dj,c,r,s)
    xsf = xs.reshape(N, 4 * C_in, R * S)
    xsf = jnp.pad(xsf, ((0, 0), (0, 0), (0, LI - R * S)))                # (N, 4*C_in, LI) f32

    # Weights regrouped by tap-offset group g=(bi,bj): w4[g, co, (di,dj,c)] = w[co,c,2bi+di,2bj+dj]
    w6 = w.reshape(C_out, C_in, 2, 2, 2, 2)                              # (co,c,bi,di,bj,dj)
    w4 = w6.transpose(2, 4, 0, 3, 5, 1).reshape(4, C_out, 4 * C_in)      # f32; cast in-kernel

    # Valid-column mask over the flattened (r, s) grid: r < OH and s < OW.
    t = jnp.arange(LO)
    mask = ((t < R * S) & ((t % S) < OW) & ((t // S) < OH)).astype(jnp.float32).reshape(1, LO)

    offsets = (0, 1, S, S + 1)     # flat-grid window shift for tap group g = (bi, bj)
    inv_m = 1.0 / float(M)

    def kernel(x_ref, w_ref, mask_ref, gamma_ref, beta_ref, o_ref,
               xa_ref, y_ref, sum_ref, ssq_ref):
        phase = pl.program_id(0)   # 0: conv + stats accumulation, 1: normalize + write
        n = pl.program_id(1)       # batch index

        @pl.when(phase == 0)
        def _conv_and_stats():
            @pl.when(n == 0)
            def _init():
                sum_ref[...] = jnp.zeros_like(sum_ref)
                ssq_ref[...] = jnp.zeros_like(ssq_ref)

            # LeakyReLU exactly once per input element; keep the activated block in VMEM (bf16).
            xb = x_ref[0]                                               # (4*C_in, LI) f32
            xa_ref[...] = jnp.where(xb >= 0.0, xb, 0.2 * xb).astype(jnp.bfloat16)

            # In-VMEM tap gather: 4 shifted windows, one small MXU matmul each, f32 accumulation.
            # Conv bias omitted: training-mode BN's mean subtraction cancels it exactly.
            y = jnp.zeros((C_out, LO), jnp.float32)
            for g, off in enumerate(offsets):
                win = xa_ref[:, pl.ds(off, LO)]                         # (4*C_in, LO) bf16
                wt = w_ref[g].astype(jnp.bfloat16)                      # (C_out, 4*C_in) bf16
                y = y + jnp.dot(wt, win, preferred_element_type=jnp.float32)
            y_ref[n] = y                                                # VMEM-resident, no HBM
            o_ref[0] = y     # benign write; overwritten with normalized values in phase 1

            # BN partial sums over valid output columns only.
            ym = y * mask_ref[...]
            sum_ref[...] += jnp.sum(ym, axis=1, keepdims=True)
            ssq_ref[...] += jnp.sum(ym * ym, axis=1, keepdims=True)

        @pl.when(phase == 1)
        def _normalize():
            mean = sum_ref[...] * inv_m
            var = ssq_ref[...] * inv_m - mean * mean                    # biased var (BN training)
            scale = gamma_ref[...] * jax.lax.rsqrt(var + eps)
            shift = beta_ref[...] - mean * scale
            o_ref[0] = y_ref[n] * scale + shift

    out = pl.pallas_call(
        kernel,
        out_shape=jax.ShapeDtypeStruct((N, C_out, LO), jnp.float32),
        grid=(2, N),
        in_specs=[
            # activations: batch block in phase 0, parked on block 0 in phase 1 (no re-DMA)
            pl.BlockSpec((1, 4 * C_in, LI), lambda p, n: (n * (1 - p), 0, 0)),
            pl.BlockSpec((4, C_out, 4 * C_in), lambda p, n: (0, 0, 0)),   # weights resident
            pl.BlockSpec((1, LO), lambda p, n: (0, 0)),                   # valid-column mask
            pl.BlockSpec((C_out, 1), lambda p, n: (0, 0)),                # gamma
            pl.BlockSpec((C_out, 1), lambda p, n: (0, 0)),                # beta
        ],
        # phase 0: stay on block 0 (never flushed with garbage); phase 1: write block n
        out_specs=pl.BlockSpec((1, C_out, LO), lambda p, n: (n * p, 0, 0)),
        scratch_shapes=[
            pltpu.VMEM((4 * C_in, LI), jnp.bfloat16),   # activated input block
            pltpu.VMEM((N, C_out, LO), jnp.float32),    # VMEM-resident conv output (all batches)
            pltpu.VMEM((C_out, 1), jnp.float32),        # per-channel sum accumulator
            pltpu.VMEM((C_out, 1), jnp.float32),        # per-channel sum-of-squares accumulator
        ],
        compiler_params=pltpu.CompilerParams(
            dimension_semantics=("arbitrary", "arbitrary")),
    )(xsf, w4, mask, gamma.reshape(C_out, 1), beta.reshape(C_out, 1))

    # Drop the padded (R, S) halo columns; reshape back to NCHW (output-sized slice only,
    # no transpose).  TODO(synk): an in-kernel lane compaction could remove this slice too.
    out = out[:, :, :R * S].reshape(N, C_out, R, S)[:, :, :OH, :OW]
    return out


def _reference(x, w, b, gamma, beta, *, stride=2, padding=1):
    """Pure-JAX f32 reference matching the PyTorch forward (training-mode BN, with bias)."""
    fx = jnp.where(x >= 0.0, x, 0.2 * x)
    y = jax.lax.conv_general_dilated(
        fx, w, window_strides=(stride, stride),
        padding=((padding, padding), (padding, padding)),
        dimension_numbers=("NCHW", "OIHW", "NCHW"))
    y = y + b.reshape(1, -1, 1, 1)
    mean = jnp.mean(y, axis=(0, 2, 3), keepdims=True)
    var = jnp.mean(jnp.square(y - mean), axis=(0, 2, 3), keepdims=True)
    y = (y - mean) * jax.lax.rsqrt(var + 1e-5)
    return y * gamma.reshape(1, -1, 1, 1) + beta.reshape(1, -1, 1, 1)


if __name__ == "__main__":
    key = jax.random.PRNGKey(0)
    k_x, k_w, k_b, k_g, k_bt = jax.random.split(key, 5)

    # Small shapes consistent with the module: N=2, C_in=4, H=W=16 -> C_out=8, OH=OW=8
    N, C_in, H, W = 2, 4, 16, 16
    C_out, KH, KW = 8, 4, 4

    x = jax.random.normal(k_x, (N, C_in, H, W), dtype=jnp.float32)
    w = jax.random.normal(k_w, (C_out, C_in, KH, KW), dtype=jnp.float32) * 0.1
    b = jax.random.normal(k_b, (C_out,), dtype=jnp.float32) * 0.1
    gamma = 1.0 + 0.1 * jax.random.normal(k_g, (C_out,), dtype=jnp.float32)
    beta = 0.1 * jax.random.normal(k_bt, (C_out,), dtype=jnp.float32)

    out = jax.block_until_ready(encoder_block(x, w, b, gamma, beta))
    ref = jax.block_until_ready(_reference(x, w, b, gamma, beta))

    assert out.shape == (N, C_out, H // 2, W // 2), out.shape
    # bf16 MXU inputs -> compare to the f32 reference at bf16-level tolerance.
    err = float(jnp.max(jnp.abs(out - ref)))
    assert jnp.allclose(out, ref, atol=5e-2, rtol=5e-2), err

    print("KERNEL_OK")
</pallas_src>

<mosaic_0001>
module attributes {stable_mosaic.version = 11 : i64} {
  func.func @kernel(%arg0: i32, %arg1: i32, %arg2: memref<1x16x256xf32, #tpu.memory_space<vmem>>, %arg3: memref<4x8x16xf32, #tpu.memory_space<vmem>>, %arg4: memref<1x128xf32, #tpu.memory_space<vmem>>, %arg5: memref<8x1xf32, #tpu.memory_space<vmem>>, %arg6: memref<8x1xf32, #tpu.memory_space<vmem>>, %arg7: memref<1x8x128xf32, #tpu.memory_space<vmem>>, %arg8: memref<16x256xbf16, #tpu.memory_space<vmem>>, %arg9: memref<2x8x128xf32, #tpu.memory_space<vmem>>, %arg10: memref<8x1xf32, #tpu.memory_space<vmem>>, %arg11: memref<8x1xf32, #tpu.memory_space<vmem>>) attributes {dimension_semantics = [#tpu.dimension_semantics<arbitrary>, #tpu.dimension_semantics<arbitrary>], iteration_bounds = array<i64: 2, 2>, scalar_prefetch = 0 : i64, scratch_operands = 4 : i64, tpu.core_type = #tpu.core_type<tc>, window_params = [{transform_indices = @transform_0, window_bounds = array<i64: 1, 16, 256>}, {pipeline_mode = #tpu.pipeline_mode<synchronous>, transform_indices = @transform_1, window_bounds = array<i64: 4, 8, 16>}, {pipeline_mode = #tpu.pipeline_mode<synchronous>, transform_indices = @transform_2, window_bounds = array<i64: 1, 128>}, {pipeline_mode = #tpu.pipeline_mode<synchronous>, transform_indices = @transform_3, window_bounds = array<i64: 8, 1>}, {pipeline_mode = #tpu.pipeline_mode<synchronous>, transform_indices = @transform_4, window_bounds = array<i64: 8, 1>}, {transform_indices = @transform_5, window_bounds = array<i64: 1, 8, 128>}]} {
    %c0_i32 = arith.constant 0 : i32
    %0 = arith.cmpi eq, %arg0, %c0_i32 : i32
    %1 = arith.extui %0 : i1 to i32
    %c0_i32_0 = arith.constant 0 : i32
    %2 = arith.cmpi ne, %1, %c0_i32_0 : i32
    scf.if %2 {
      %c0_i32_2 = arith.constant 0 : i32
      %6 = arith.cmpi eq, %arg1, %c0_i32_2 : i32
      %7 = arith.extui %6 : i1 to i32
      %c0_i32_3 = arith.constant 0 : i32
      %8 = arith.cmpi ne, %7, %c0_i32_3 : i32
      scf.if %8 {
        %cst_46 = arith.constant 0.000000e+00 : f32
        %64 = vector.broadcast %cst_46 : f32 to vector<8x1xf32>
        %c0_47 = arith.constant 0 : index
        %c0_48 = arith.constant 0 : index
        %65 = vector.load %arg10[%c0_47, %c0_48] : memref<8x1xf32, #tpu.memory_space<vmem>>, vector<8x1xf32>
        tpu.vector_store %arg10[%c0_47, %c0_48], %64 {strides = array<i32>} : memref<8x1xf32, #tpu.memory_space<vmem>>, vector<8x1xf32>,
        %cst_49 = arith.constant 0.000000e+00 : f32
        %66 = vector.broadcast %cst_49 : f32 to vector<8x1xf32>
        %c0_50 = arith.constant 0 : index
        %c0_51 = arith.constant 0 : index
        %67 = vector.load %arg11[%c0_50, %c0_51] : memref<8x1xf32, #tpu.memory_space<vmem>>, vector<8x1xf32>
        tpu.vector_store %arg11[%c0_50, %c0_51], %66 {strides = array<i32>} : memref<8x1xf32, #tpu.memory_space<vmem>>, vector<8x1xf32>,
      } else {
      }
      %c0 = arith.constant 0 : index
      %c0_4 = arith.constant 0 : index
      %c0_5 = arith.constant 0 : index
      %9 = vector.load %arg2[%c0, %c0_4, %c0_5] : memref<1x16x256xf32, #tpu.memory_space<vmem>>, vector<1x16x256xf32>
      %10 = vector.shape_cast %9 : vector<1x16x256xf32> to vector<16x256xf32>
      %cst = arith.constant 0.000000e+00 : f32
      %11 = vector.broadcast %cst : f32 to vector<16x256xf32>
      %12 = arith.cmpf oge, %10, %11 : vector<16x256xf32>
      %cst_6 = arith.constant 2.000000e-01 : f32
      %13 = vector.broadcast %cst_6 : f32 to vector<16x256xf32>
      %14 = arith.mulf %13, %10 : vector<16x256xf32>
      %15 = arith.select %12, %10, %14 : vector<16x256xi1>, vector<16x256xf32>
      %16 = arith.truncf %15 : vector<16x256xf32> to vector<16x256xbf16>
      %c0_7 = arith.constant 0 : index
      %c0_8 = arith.constant 0 : index
      %17 = vector.load %arg8[%c0_7, %c0_8] : memref<16x256xbf16, #tpu.memory_space<vmem>>, vector<16x256xbf16>
      tpu.vector_store %arg8[%c0_7, %c0_8], %16 {strides = array<i32>} : memref<16x256xbf16, #tpu.memory_space<vmem>>, vector<16x256xbf16>,
      %cst_9 = arith.constant 0.000000e+00 : f32
      %18 = vector.broadcast %cst_9 : f32 to vector<8x128xf32>
      %c0_10 = arith.constant 0 : index
      %c0_11 = arith.constant 0 : index
      %19 = vector.load %arg8[%c0_10, %c0_11] : memref<16x256xbf16, #tpu.memory_space<vmem>>, vector<16x128xbf16>
      %c0_12 = arith.constant 0 : index
      %c0_13 = arith.constant 0 : index
      %c0_14 = arith.constant 0 : index
      %20 = vector.load %arg3[%c0_12, %c0_13, %c0_14] : memref<4x8x16xf32, #tpu.memory_space<vmem>>, vector<1x8x16xf32>
      %21 = vector.shape_cast %20 : vector<1x8x16xf32> to vector<8x16xf32>
      %22 = arith.truncf %21 : vector<8x16xf32> to vector<8x16xbf16>
      %cst_15 = arith.constant dense<0.000000e+00> : vector<8x128xf32>
      %23 = tpu.matmul %22, %19, %cst_15 {dimension_numbers = #tpu.dot_dimension_numbers<[1], [0], [0], [1], [0, 0, 1, 1], [], []>} : vector<8x16xbf16>, vector<16x128xbf16>, vector<8x128xf32> -> vector<8x128xf32>
      %24 = arith.addf %18, %23 : vector<8x128xf32>
      %c0_16 = arith.constant 0 : index
      %c1 = arith.constant 1 : index
      %25 = vector.load %arg8[%c0_16, %c1] : memref<16x256xbf16, #tpu.memory_space<vmem>>, vector<16x128xbf16>
      %c1_17 = arith.constant 1 : index
      %c0_18 = arith.constant 0 : index
      %c0_19 = arith.constant 0 : index
      %26 = vector.load %arg3[%c1_17, %c0_18, %c0_19] : memref<4x8x16xf32, #tpu.memory_space<vmem>>, vector<1x8x16xf32>
      %27 = vector.shape_cast %26 : vector<1x8x16xf32> to vector<8x16xf32>
      %28 = arith.truncf %27 : vector<8x16xf32> to vector<8x16xbf16>
      %cst_20 = arith.constant dense<0.000000e+00> : vector<8x128xf32>
      %29 = tpu.matmul %28, %25, %cst_20 {dimension_numbers = #tpu.dot_dimension_numbers<[1], [0], [0], [1], [0, 0, 1, 1], [], []>} : vector<8x16xbf16>, vector<16x128xbf16>, vector<8x128xf32> -> vector<8x128xf32>
      %30 = arith.addf %24, %29 : vector<8x128xf32>
      %c0_21 = arith.constant 0 : index
      %c9 = arith.constant 9 : index
      %31 = vector.load %arg8[%c0_21, %c9] : memref<16x256xbf16, #tpu.memory_space<vmem>>, vector<16x128xbf16>
      %c2 = arith.constant 2 : index
      %c0_22 = arith.constant 0 : index
      %c0_23 = arith.constant 0 : index
      %32 = vector.load %arg3[%c2, %c0_22, %c0_23] : memref<4x8x16xf32, #tpu.memory_space<vmem>>, vector<1x8x16xf32>
      %33 = vector.shape_cast %32 : vector<1x8x16xf32> to vector<8x16xf32>
      %34 = arith.truncf %33 : vector<8x16xf32> to vector<8x16xbf16>
      %cst_24 = arith.constant dense<0.000000e+00> : vector<8x128xf32>
      %35 = tpu.matmul %34, %31, %cst_24 {dimension_numbers = #tpu.dot_dimension_numbers<[1], [0], [0], [1], [0, 0, 1, 1], [], []>} : vector<8x16xbf16>, vector<16x128xbf16>, vector<8x128xf32> -> vector<8x128xf32>
      %36 = arith.addf %30, %35 : vector<8x128xf32>
      %c0_25 = arith.constant 0 : index
      %c10 = arith.constant 10 : index
      %37 = vector.load %arg8[%c0_25, %c10] : memref<16x256xbf16, #tpu.memory_space<vmem>>, vector<16x128xbf16>
      %c3 = arith.constant 3 : index
      %c0_26 = arith.constant 0 : index
      %c0_27 = arith.constant 0 : index
      %38 = vector.load %arg3[%c3, %c0_26, %c0_27] : memref<4x8x16xf32, #tpu.memory_space<vmem>>, vector<1x8x16xf32>
      %39 = vector.shape_cast %38 : vector<1x8x16xf32> to vector<8x16xf32>
      %40 = arith.truncf %39 : vector<8x16xf32> to vector<8x16xbf16>
      %cst_28 = arith.constant dense<0.000000e+00> : vector<8x128xf32>
      %41 = tpu.matmul %40, %37, %cst_28 {dimension_numbers = #tpu.dot_dimension_numbers<[1], [0], [0], [1], [0, 0, 1, 1], [], []>} : vector<8x16xbf16>, vector<16x128xbf16>, vector<8x128xf32> -> vector<8x128xf32>
      %42 = arith.addf %36, %41 : vector<8x128xf32>
      %43 = arith.index_cast %arg1 : i32 to index
      %c0_29 = arith.constant 0 : index
      %c0_30 = arith.constant 0 : index
      %44 = vector.load %arg9[%43, %c0_29, %c0_30] : memref<2x8x128xf32, #tpu.memory_space<vmem>>, vector<1x8x128xf32>
      %45 = vector.shape_cast %44 : vector<1x8x128xf32> to vector<8x128xf32>
      %46 = vector.shape_cast %42 : vector<8x128xf32> to vector<1x8x128xf32>
      tpu.vector_store %arg9[%43, %c0_29, %c0_30], %46 {strides = array<i32>} : memref<2x8x128xf32, #tpu.memory_space<vmem>>, vector<1x8x128xf32>,
      %c0_31 = arith.constant 0 : index
      %c0_32 = arith.constant 0 : index
      %c0_33 = arith.constant 0 : index
      %47 = vector.load %arg7[%c0_31, %c0_32, %c0_33] : memref<1x8x128xf32, #tpu.memory_space<vmem>>, vector<1x8x128xf32>
      %48 = vector.shape_cast %47 : vector<1x8x128xf32> to vector<8x128xf32>
      %49 = vector.shape_cast %42 : vector<8x128xf32> to vector<1x8x128xf32>
      tpu.vector_store %arg7[%c0_31, %c0_32, %c0_33], %49 {strides = array<i32>} : memref<1x8x128xf32, #tpu.memory_space<vmem>>, vector<1x8x128xf32>,
      %c0_34 = arith.constant 0 : index
      %c0_35 = arith.constant 0 : index
      %50 = vector.load %arg4[%c0_34, %c0_35] : memref<1x128xf32, #tpu.memory_space<vmem>>, vector<1x128xf32>
      %51 = vector.broadcast %50 : vector<1x128xf32> to vector<8x128xf32>
      %52 = arith.mulf %42, %51 : vector<8x128xf32>
      %c0_36 = arith.constant 0 : index
      %c0_37 = arith.constant 0 : index
      %53 = vector.load %arg10[%c0_36, %c0_37] : memref<8x1xf32, #tpu.memory_space<vmem>>, vector<8x1xf32>
      %cst_38 = arith.constant dense<0.000000e+00> : vector<8xf32>
      %54 = vector.multi_reduction <add>, %52, %cst_38 [1] : vector<8x128xf32> to vector<8xf32>
      %55 = vector.shape_cast %54 : vector<8xf32> to vector<8x1xf32>
      %56 = arith.addf %53, %55 : vector<8x1xf32>
      %c0_39 = arith.constant 0 : index
      %c0_40 = arith.constant 0 : index
      %57 = vector.load %arg10[%c0_39, %c0_40] : memref<8x1xf32, #tpu.memory_space<vmem>>, vector<8x1xf32>
      tpu.vector_store %arg10[%c0_39, %c0_40], %56 {strides = array<i32>} : memref<8x1xf32, #tpu.memory_space<vmem>>, vector<8x1xf32>,
      %c0_41 = arith.constant 0 : index
      %c0_42 = arith.constant 0 : index
      %58 = vector.load %arg11[%c0_41, %c0_42] : memref<8x1xf32, #tpu.memory_space<vmem>>, vector<8x1xf32>
      %59 = arith.mulf %52, %52 : vector<8x128xf32>
      %cst_43 = arith.constant dense<0.000000e+00> : vector<8xf32>
      %60 = vector.multi_reduction <add>, %59, %cst_43 [1] : vector<8x128xf32> to vector<8xf32>
      %61 = vector.shape_cast %60 : vector<8xf32> to vector<8x1xf32>
      %62 = arith.addf %58, %61 : vector<8x1xf32>
      %c0_44 = arith.constant 0 : index
      %c0_45 = arith.constant 0 : index
      %63 = vector.load %arg11[%c0_44, %c0_45] : memref<8x1xf32, #tpu.memory_space<vmem>>, vector<8x1xf32>
      tpu.vector_store %arg11[%c0_44, %c0_45], %62 {strides = array<i32>} : memref<8x1xf32, #tpu.memory_space<vmem>>, vector<8x1xf32>,
    } else {
    }
    %c1_i32 = arith.constant 1 : i32
    %3 = arith.cmpi eq, %arg0, %c1_i32 : i32
    %4 = arith.extui %3 : i1 to i32
    %c0_i32_1 = arith.constant 0 : i32
    %5 = arith.cmpi ne, %4, %c0_i32_1 : i32
    scf.if %5 {
      %c0 = arith.constant 0 : index
      %c0_2 = arith.constant 0 : index
      %6 = vector.load %arg10[%c0, %c0_2] : memref<8x1xf32, #tpu.memory_space<vmem>>, vector<8x1xf32>
      %cst = arith.constant 7.812500e-03 : f32
      %7 = vector.broadcast %cst : f32 to vector<8x1xf32>
      %8 = arith.mulf %6, %7 : vector<8x1xf32>
      %c0_3 = arith.constant 0 : index
      %c0_4 = arith.constant 0 : index
      %9 = vector.load %arg11[%c0_3, %c0_4] : memref<8x1xf32, #tpu.memory_space<vmem>>, vector<8x1xf32>
      %cst_5 = arith.constant 7.812500e-03 : f32
      %10 = vector.broadcast %cst_5 : f32 to vector<8x1xf32>
      %11 = arith.mulf %9, %10 : vector<8x1xf32>
      %12 = arith.mulf %8, %8 : vector<8x1xf32>
      %13 = arith.subf %11, %12 : vector<8x1xf32>
      %c0_6 = arith.constant 0 : index
      %c0_7 = arith.constant 0 : index
      %14 = vector.load %arg5[%c0_6, %c0_7] : memref<8x1xf32, #tpu.memory_space<vmem>>, vector<8x1xf32>
      %cst_8 = arith.constant 9.99999974E-6 : f32
      %15 = vector.broadcast %cst_8 : f32 to vector<8x1xf32>
      %16 = arith.addf %13, %15 : vector<8x1xf32>
      %17 = math.rsqrt %16 : vector<8x1xf32>
      %18 = arith.mulf %14, %17 : vector<8x1xf32>
      %c0_9 = arith.constant 0 : index
      %c0_10 = arith.constant 0 : index
      %19 = vector.load %arg6[%c0_9, %c0_10] : memref<8x1xf32, #tpu.memory_space<vmem>>, vector<8x1xf32>
      %20 = arith.mulf %8, %18 : vector<8x1xf32>
      %21 = arith.subf %19, %20 : vector<8x1xf32>
      %22 = arith.index_cast %arg1 : i32 to index
      %c0_11 = arith.constant 0 : index
      %c0_12 = arith.constant 0 : index
      %23 = vector.load %arg9[%22, %c0_11, %c0_12] : memref<2x8x128xf32, #tpu.memory_space<vmem>>, vector<1x8x128xf32>
      %24 = vector.shape_cast %23 : vector<1x8x128xf32> to vector<8x128xf32>
      %25 = vector.broadcast %18 : vector<8x1xf32> to vector<8x128xf32>
      %26 = arith.mulf %24, %25 : vector<8x128xf32>
      %27 = vector.broadcast %21 : vector<8x1xf32> to vector<8x128xf32>
      %28 = arith.addf %26, %27 : vector<8x128xf32>
      %c0_13 = arith.constant 0 : index
      %c0_14 = arith.constant 0 : index
      %c0_15 = arith.constant 0 : index
      %29 = vector.load %arg7[%c0_13, %c0_14, %c0_15] : memref<1x8x128xf32, #tpu.memory_space<vmem>>, vector<1x8x128xf32>
      %30 = vector.shape_cast %29 : vector<1x8x128xf32> to vector<8x128xf32>
      %31 = vector.shape_cast %28 : vector<8x128xf32> to vector<1x8x128xf32>
      tpu.vector_store %arg7[%c0_13, %c0_14, %c0_15], %31 {strides = array<i32>} : memref<1x8x128xf32, #tpu.memory_space<vmem>>, vector<1x8x128xf32>,
    } else {
    }
    return
  }
  func.func @transform_0(%arg0: i32, %arg1: i32) -> (i32, i32, i32) {
    %c1_i32 = arith.constant 1 : i32
    %0 = arith.subi %c1_i32, %arg0 : i32
    %1 = arith.muli %arg1, %0 : i32
    %c0_i32 = arith.constant 0 : i32
    %c0_i32_0 = arith.constant 0 : i32
    %c0_i32_1 = arith.constant 0 : i32
    return %1, %c0_i32, %c0_i32_0 : i32, i32, i32
  }
  func.func @transform_1(%arg0: i32, %arg1: i32) -> (i32, i32, i32) {
    %c0_i32 = arith.constant 0 : i32
    %c0_i32_0 = arith.constant 0 : i32
    %c0_i32_1 = arith.constant 0 : i32
    %c0_i32_2 = arith.constant 0 : i32
    return %c0_i32, %c0_i32_0, %c0_i32_1 : i32, i32, i32
  }
  func.func @transform_2(%arg0: i32, %arg1: i32) -> (i32, i32) {
    %c0_i32 = arith.constant 0 : i32
    %c0_i32_0 = arith.constant 0 : i32
    %c0_i32_1 = arith.constant 0 : i32
    return %c0_i32, %c0_i32_0 : i32, i32
  }
  func.func @transform_3(%arg0: i32, %arg1: i32) -> (i32, i32) {
    %c0_i32 = arith.constant 0 : i32
    %c0_i32_0 = arith.constant 0 : i32
    %c0_i32_1 = arith.constant 0 : i32
    return %c0_i32, %c0_i32_0 : i32, i32
  }
  func.func @transform_4(%arg0: i32, %arg1: i32) -> (i32, i32) {
    %c0_i32 = arith.constant 0 : i32
    %c0_i32_0 = arith.constant 0 : i32
    %c0_i32_1 = arith.constant 0 : i32
    return %c0_i32, %c0_i32_0 : i32, i32
  }
  func.func @transform_5(%arg0: i32, %arg1: i32) -> (i32, i32, i32) {
    %0 = arith.muli %arg1, %arg0 : i32
    %c0_i32 = arith.constant 0 : i32
    %c0_i32_0 = arith.constant 0 : i32
    %c0_i32_1 = arith.constant 0 : i32
    return %0, %c0_i32, %c0_i32_0 : i32, i32, i32
  }
}

</mosaic_0001>

<bundles_post_ra>
// kernel: tpu_custom_call.1
= control target key start
LH: loop header
LB: loop body
LE: loop exit
PB: predicated region body
PF: predicated region fallthrough
CT: control target
= control target key end

     0   :  { %s1225_s0 = inlined_call_operand.hbm [shape: f32[2,16,256], index: 0, kind: input, shape index: {}]   ;;  %s1226_s1 = inlined_call_operand.hbm [shape: f32[4,8,16], index: 1, kind: input, shape index: {}]   ;;  %s1227_s2 = inlined_call_operand.vmem [shape: f32[1,128], index: 2, kind: input, shape index: {}]   ;;  %s1228_s3 = inlined_call_operand.vmem [shape: f32[8,1], index: 3, kind: input, shape index: {}]   ;;  %s1229_s4 = inlined_call_operand.vmem [shape: f32[8,1], index: 4, kind: input, shape index: {}]   ;;  %s1230_s5 = inlined_call_operand.hbm [shape: f32[2,8,128], index: 5, kind: output, shape index: {}]  }
   0x1   :  { %1240 = sst [smem:[#allocation23_spill]] %s1226_s1 }
   0x2   :  { %1241 = sst [smem:[#allocation24_spill]] %s1227_s2 }
   0x3   :  { %1242 = sst [smem:[#allocation25_spill]] %s1228_s3 }
   0x4   :  { %1243 = sst [smem:[#allocation26_spill]] %s1229_s4 }
   0x5   :  { %1244 = sst [smem:[#allocation27_spill]] %s1230_s5 }
   0x6   :  { %10 = vsyncpa [#allocation7], 0 }
   0x7   :  { %12 = vsyncpa [#allocation7 + $0x1], 0 }
   0x8   :  { %13 = vsyncpa [#allocation10], 0 }
   0x9   :  { %14 = vsyncpa [#allocation8], 0 }
   0xa   :  { %16 = vsyncpa [#allocation8 + $0x1], 0  ;;  %s1004_s18 = smov 0   ;;  %s1006_s19 = smov 0  }
   0xb   :  { %s1008_s20 = smov 0   ;;  %s1010_s21 = smov 0  }
   0xc   :  { %s1012_s22 = smov 0   ;;  %s1014_s23 = smov 0  }
   0xd   :  { %s1016_s24 = smov 0   ;;  %s1018_s25 = smov 0  }
   0xe   :  { %s1020_s26 = smov 0   ;;  %s1022_s27 = smov 0  }
   0xf   :  { %s1024_s28 = smov 0  }
  0x10 LB: > { %1245 = sst [smem:[#allocation15_spill]] %s922_s18  ;;  %s609_s29 = sadd.s32 4294967295, %s962_s28   ;;  %s962_s28 = sphi %s1024_s28, %s22_s28   ;;  %s958_s27 = sphi %s1022_s27, %s1286_s27   ;;  %s954_s26 = sphi %s1020_s26, %s1285_s26   ;;  %s950_s25 = sphi %s1018_s25, %s1278_s25   ;;  %s946_s24 = sphi %s1016_s24, %s1277_s24   ;;  %s942_s23 = sphi %s1014_s23, %s1284_s23   ;;  %s938_s22 = sphi %s1012_s22, %s1283_s22   ;;  %s934_s21 = sphi %s1010_s21, %s1282_s21   ;;  %s930_s20 = sphi %s1008_s20, %s1281_s20   ;;  %s926_s19 = sphi %s1006_s19, %s1280_s19   ;;  %s922_s18 = sphi %s1004_s18, %s1276_s18  }
  0x11   : > { %1246 = sst [smem:[#allocation16_spill]] %s926_s19  ;;  %s610_s30 = sadd.s32 4294967294, %s962_s28  }
  0x12   : > { %1247 = sst [smem:[#allocation17_spill]] %s946_s24  ;;  %p58_p0 = scmp.ne.s32.totalorder %s938_s22, %s934_s21 }
  0x13   : > { %1248 = sst [smem:[#allocation18_spill]] %s950_s25  ;;  %p1060_p1 = scmp.eq.s32.totalorder %s609_s29, 0 }
  0x14   : > { %1249 = sst [smem:[#allocation19_spill]] %s954_s26  ;;  %p167_p2 = scmp.ne.s32.totalorder %s930_s20, %s926_s19 }
  0x15   : > { %1250 = sst [smem:[#allocation20_spill]] %s958_s27  ;;  %p168_p3 = scmp.eq.s32.totalorder %s609_s29, 3 }
  0x16   : > { %p1068_p4 = por %p1060_p1, %p58_p0  ;;  %p173_p5 = scmp.ne.s32.totalorder %s926_s19, %s922_s18 }
  0x17   : > { %p1074_p6 = por %p168_p3, %p167_p2  ;;  %p174_p7 = scmp.eq.s32.totalorder %s610_s30, 3 }
  0x18   : > { %p611_p8 = scmp.ge.s32.totalorder %s962_s28, 1  ;;  %p181_p9 = scmp.lt.s32.totalorder %s962_s28, 5 }
  0x19   : > { %s1253_s8 = scalar_select %p1074_p6, 1, 0 }
  0x1a   : > { %p1080_p10 = por %p174_p7, %p173_p5  ;;  %p1084_p11 = pnand %p611_p8, %p181_p9 }
  0x1b   : > { %1254 = sst [smem:[#allocation21_spill]] %s1253_s8  ;;  %s964_s14 = smov [#allocation9]  }
  0x1c   : > { %s1255_s9 = scalar_select %p1080_p10, 1, 0 }
  0x1d   : > { %s1258_s1 = sld [smem:[#allocation23_spill]]  ;;  %p658_p12 = pneg %p1084_p11 }
  0x1e   : > { %1256 = sst [smem:[#allocation22_spill]] %s1255_s9  ;;  %s194_s15 = sshll.u32 %s964_s14, 4  ;;  %s195_s15 = int_to_ptr.vmem [resolvable:$true] %s194_s15 }
  0x1f   : > { %p659_p13 = pnand %p658_p12, %p1060_p1  ;;  %s965_s16 = smov 128  }
  0x20   : > { %s966_s17 = smov 8   ;;  %s31_s21 = sadd.s32 1, %s954_s26 }
  0x21   : > { %s34_s29 = sadd.s32 1, %s958_s27  ;;  %p32_p0 = scmp.ge.s32.totalorder %s31_s21, 2 }
  0x22   : > { %s38_s30 = ssub.s32 1, %s958_s27  ;;  %s45_s12 = sadd.s32 1, %s942_s23 }
  0x23   : > { %s192_s13 = sshll.u32 %s1258_s1, 4  ;;  %s39_s11 = smul.u32 %s954_s26, %s38_s30  ;;  %s193_s13 = int_to_ptr.hbm [resolvable:$true] %s192_s13 }
  0x24   : > { %661 = dma.hbm_to_vmem [thread:$0]  (!%p659_p13), %s193_s13, 512, %s195_s15, [#allocation10], %s965_s16, %s965_s16, %s966_s17  }
  0x25   : > { %s1288_s21 = smov (%p32_p0, %s31_s21), 0  ;;  %s1290_s29 = smov (!%p32_p0, %s34_s29), %s958_s27 }
  0x26   : > { %p52_p2 = scmp.ne.s32.totalorder %s942_s23, %s938_s22  ;;  %p53_p3 = scmp.eq.s32.totalorder %s962_s28, 0 }
  0x27   : > { %p36_p5 = scmp.ge.s32.totalorder %s1290_s29, 2  ;;  %s152_s14 = smul.u32 %s954_s26, %s958_s27 }
  0x28   : > { %p1108_p7 = por %p53_p3, %p52_p2  ;;  %s157_s15 = sadd.s32 1, %s930_s20 }
  0x29   : > { %s1292_s29 = smov (%p36_p5, %s1290_s29), 0  ;;  %p671_p8 = scmp.lt.s32.totalorder %s962_s28, 4 }
  0x2a   : > { %s217_s16 = sand.u32 1, %s942_s23   ;;  %s40_s17 = ssub.s32 1, %s1292_s29 }
  0x2b   : > { %s153_s30 = smul.u32 %s1292_s29, %s1288_s21  ;;  %s614_s18 = sshll.u32 %s217_s16, 5 }
  0x2c   : > { %s41_s1 = smul.u32 %s40_s17, %s1288_s21  ;;  %s646_s8 = sshll.u32 %s39_s11, 5 }
  0x2d   : > { %s154_s9 = ssub.s32 %s152_s14, %s153_s30  ;;  %s221_s4 = scalar_lea.vmem [#allocation6], %s614_s18 }
  0x2e   : > { %s42_s5 = ssub.s32 %s39_s11, %s41_s1  ;;  %p155_p9 = scmp.eq.s32.totalorder %s154_s9, 0 }
  0x2f   : > { %p43_p12 = scmp.eq.s32.totalorder %s42_s5, 0  ;;  %s231_s3 = sshll.u32 %s221_s4, 4  ;;  %s232_s3 = int_to_ptr.vmem [resolvable:$true] %s231_s3 }
  0x30   : > { %s1122_s27 = scalar_select %p155_p9, %s930_s20, %s157_s15  }
  0x31   : > { %s1125_s26 = scalar_select %p43_p12, %s942_s23, %s45_s12  }
  0x32   : > { %s228_s25 = scalar_lea.hbm %s1225_s0, %s646_s8  ;;  %p663_p13 = pnand %p671_p8, %p1108_p7 }
  0x33   : > { %s229_s19 = sshll.u32 %s228_s25, 4  ;;  %s218_s1 = scalar_lea.sflag [#allocation7], %s217_s16  ;;  %s230_s19 = int_to_ptr.hbm [resolvable:$true] %s229_s19 }
  0x34   : > { %s967_s9 = smov 256   ;;  %s968_s5 = smov 16  }
  0x35   : > { %665 = dma.hbm_to_vmem [thread:$0]  (!%p663_p13), %s230_s19, 512, %s232_s3, %s218_s1, %s967_s9, %s967_s9, %s968_s5  }
  0x36   : > { %243 = sbr.rel (%p1084_p11) target bundleno = 682 (0x2aa), region = 40  ;;  %s245_s4 = sand.u32 (!%p1084_p11), 1, %s938_s22  }
  0x37   : > { %s618_s18 = sshll.u32 (!%p1084_p11), %s245_s4, 5  ;;  %s246_s11 = scalar_lea.sflag (!%p1084_p11), [#allocation7], %s245_s4 }
  0x38   : > { %s249_s2 = scalar_lea.vmem (!%p1084_p11), [#allocation6], %s618_s18 }
  0x3b   : > { %909 = dma.done.wait (%p1068_p4), %s246_s11, 512  }
  0x3c   : > { %911 = vsyncadd (%p1068_p4), %s246_s11, 4294966784 }
  0x3d   : > { %913 = dma.done.wait (%p1060_p1), [#allocation10], 512  }
  0x3e   : > { %915 = vsyncadd (%p1060_p1), [#allocation10], 4294966784  ;;  %s1260_s3 = sld [smem:[#allocation16_spill]] }
  0x3f   : > { %s1261_s8 = sld [smem:[#allocation18_spill]] }
  0x44   : > { %s279_s19 = sand.u32 1, %s1260_s3  }
  0x45   : > { %s620_s24 = sshll.u32 %s279_s19, 3  ;;  %p621_p11 = scmp.ne.s32.totalorder %s1261_s8, 0 }
  0x46   : > { %s1148_s25 = scalar_lea.vmem [#allocation11], %s620_s24  ;;  %s1262_s10 = sld [smem:[#allocation17_spill]] (!%p621_p11) }
  0x47   : > { %289 = sbr.rel (%p621_p11) target bundleno = 490 (0x1ea), region = 52 }
  0x4c   : > { %p622_p0 = scmp.ne.s32.totalorder %s1262_s10, 0 }
  0x4e   : > { %293 = sbr.rel (%p622_p0) target bundleno = 86 (0x56), region = 56 }
  0x53   : > { %vm294_vm0 = vcmask 7168   ;;  %v969_v0 = vmov 0.0  }
  0x54   : > { %295 = vst.msk [vmem:[#allocation4] sm:$0xff] %vm294_vm0, %v969_v0 }
  0x55   : > { %296 = vst.msk [vmem:[#allocation5] sm:$0xff] %vm294_vm0, %v969_v0 }
  0x56 PF: > { %v297_v1 = vld [vmem:[%s249_s2] sm:$0xff]  ;;  %v298_v2 = vld [vmem:[%s249_s2 + $0x8] sm:$0xff]  ;;  %v299_v3 = vld [vmem:[%s249_s2 + $0x10] sm:$0xff]  ;;  %s970_s6 = smov 118   ;;  %s971_s7 = smov 119   ;;  %vm341_vm5 = vcmask 130048  }
  0x57   : > { %v300_v4 = vld [vmem:[%s249_s2 + $0x18] sm:$0xff]  ;;  %vm301_vm1 = vcmp.ge.f32.partialorder %v297_v1, 0.0  ;;  %vm302_vm2 = vcmp.ge.f32.partialorder %v298_v2, 0.0  ;;  %vm303_vm3 = vcmp.ge.f32.partialorder %v299_v3, 0.0  ;;  %v305_v5 = vmul.f32 0.2, %v297_v1 }
  0x58   : > { %vm304_vm4 = vcmp.ge.f32.partialorder %v300_v4, 0.0  ;;  %v306_v6 = vmul.f32 0.2, %v298_v2  ;;  %v307_v7 = vmul.f32 0.2, %v299_v3  ;;  %s972_s12 = smov 127  }
  0x59   : > { %v308_v8 = vmul.f32 0.2, %v300_v4  ;;  %v309_v9 = vsel %vm301_vm1, %v297_v1, %v305_v5  ;;  %v319_v24 = vld [vmem:[#allocation9] sm:$0xff]  ;;  %vm338_vm6 = vcmask 1039360   ;;  %v324_v27 = vld [vmem:[#allocation9 + $0x8] sm:$0xff]  ;;  %vm387_vm7 = vcmask 973824  }
  0x5a   : > { %v310_v10 = vsel %vm302_vm2, %v298_v2, %v306_v6  ;;  %v311_v11 = vsel %vm303_vm3, %v299_v3, %v307_v7  ;;  %v320_v25 = vpack.c.bf16 %v319_v24, %v319_v24  ;;  %v325_v30 = vpack.c.bf16 %v324_v27, %v324_v27  ;;  %v381_v33 = vld [vmem:[#allocation9 + $0x10] sm:$0xff]  ;;  %v408_v34 = vld [vmem:[#allocation9 + $0x18] sm:$0xff]  ;;  %s1263_s14 = sld [smem:[#allocation17_spill]] }
  0x5b   : > { %v312_v12 = vsel %vm304_vm4, %v300_v4, %v308_v8  ;;  %v313_v13 = vpack.c.bf16 %v310_v10, %v309_v9  ;;  %vm414_vm8 = vcmask 965632   ;;  %v382_v39 = vpack.c.bf16 %v381_v33, %v381_v33  ;;  %s1264_s17 = sld [smem:[#allocation24_spill]]  ;;  %v443_v55 = vld [vmem:[#allocation4] sm:$0xff] }
  0x5c   : > { %v314_v14 = vpack.c.bf16 %v312_v12, %v311_v11  ;;  %v409_v40 = vpack.c.bf16 %v408_v34, %v408_v34  ;;  %vm447_vm9 = vcmask 7168   ;;  %v449_v57 = vld [vmem:[#allocation5] sm:$0xff] }
  0x5d   : > { %315 = vst [vmem:[#allocation2] sm:$0xff] %v313_v13 }
  0x5e   : > { %316 = vst [vmem:[#allocation2 + $0x8] sm:$0xff] %v314_v14 }
  0x60   : > { %s639_s13 = sshll.u32 %s1263_s14, 3 }
  0x61   : > { %v772_v49 = vld [vmem:[%s1264_s17] ss:$0 sm:$0xff]  ;;  %s435_s30 = scalar_lea.vmem [#allocation3], %s639_s13 }
  0x64   : > { %v625_v15 = vld [vmem:[#allocation2] sm:$0xf]  ;;  %v648_v18 = vld [vmem:[#allocation2 + $0x4] sm:$0xf] }
  0x65   : > { %v649_v16 = vld [vmem:[#allocation2 + $0x4] sm:$0xf0]  ;;  %v627_v19 = vld [vmem:[#allocation2 + $0x8] sm:$0xf0]  ;;  %v634_v21 = vld [vmem:[#allocation2] sm:$0xf] }
  0x66   : > { %v626_v17 = vor.u32 %v649_v16, %v625_v15  ;;  %v630_v20 = vor.u32 %v648_v18, %v627_v19  ;;  %v647_v22 = vld [vmem:[#allocation2 + $0x4] sm:$0xf0] }
  0x67   : > { %v635_v23 = vor.u32 %v647_v22, %v634_v21 }
  0x68   : > { %410 = vrot.lane.b32.xlu1 %v626_v17, %s970_s6  ;;  %383 = vrot.lane.b32.xlu0 %v626_v17, %s971_s7 }
  0x69   : > { %334 = vrot.lane.b32.xlu2 %v626_v17, %s972_s12  ;;  %374 = vmatpush.bf16.msra.mxu1 %v635_v23 }
  0x6c   : > { %636 = vmatmul.msk.bf16.vlgmr.msra.gmra.mxu1 %vm341_vm5, %v320_v25 }
  0x70   : > { %412 = vrot.lane.b32.xlu1 %v630_v20, %s970_s6  ;;  %385 = vrot.lane.b32.xlu0 %v630_v20, %s971_s7 }
  0x71   : > { %336 = vrot.lane.b32.xlu2 %v630_v20, %s972_s12 }
  0xc3   : > { %v335_v26 = vpop.permute.xlu2 %334 }
  0xcb   : > { %v337_v28 = vpop.permute.xlu2 %336 }
  0xcc   : > { %v339_v29 = vsel %vm338_vm6, %v335_v26, %v337_v28 }
  0xcd   : > { %352 = vmatpush.bf16.msra.mxu0 %v339_v29 }
  0xd0   : > { %631 = vmatmul.msk.bf16.vlgmr.msra.gmra.mxu0 %vm341_vm5, %v325_v30 }
  0xda   : > { %v411_v31 = vpop.permute.xlu1 %410  ;;  %v384_v32 = vpop.permute.xlu0 %383 }
  0xe2   : > { %v413_v35 = vpop.permute.xlu1 %412  ;;  %v386_v36 = vpop.permute.xlu0 %385 }
  0xe3   : > { %v388_v37 = vsel %vm387_vm7, %v384_v32, %v386_v36  ;;  %v415_v38 = vsel %vm414_vm8, %v411_v31, %v413_v35 }
  0xe4   : > { %400 = vmatpush.bf16.msra.mxu2 %v388_v37  ;;  %427 = vmatpush.bf16.msra.mxu3 %v415_v38 }
  0xe7   : > { %637 = vmatmul.msk.bf16.vlgmr.msra.gmra.mxu2 %vm341_vm5, %v382_v39  ;;  %638 = vmatmul.msk.bf16.vlgmr.msra.gmra.mxu3 %vm341_vm5, %v409_v40 }
  0xe9   : > { %v376_v41 = vpop.f32.mrf.mxu1 }
  0xf1   : > { %v378_v42 = vpop.f32.mrf.mxu1 }
 0x14d   : > { %v354_v43 = vpop.f32.mrf.mxu0 }
 0x14e   : > { %v377_v45 = vadd.f32 %v376_v41, %v354_v43 }
 0x155   : > { %v356_v44 = vpop.f32.mrf.mxu0 }
 0x16a   : > { %v402_v46 = vpop.f32.mrf.mxu2  ;;  %v429_v47 = vpop.f32.mrf.mxu3 }
 0x16b   : > { %v406_v48 = vadd.f32 %v402_v46, %v377_v45 }
 0x16d   : > { %v433_v50 = vadd.f32 %v429_v47, %v406_v48 }
 0x16f   : > { %436 = vst [vmem:[%s435_s30] sm:$0xff] %v433_v50  ;;  %v442_v51 = vmul.f32 %v772_v49, %v433_v50 }
 0x170   : > { %437 = vst [vmem:[%s1148_s25] sm:$0xff] %v433_v50 }
 0x171   : > { %444 = vadd.xlane.f32.xlu0 %v442_v51  ;;  %v450_v52 = vmul.f32 %v442_v51, %v442_v51 }
 0x172   : > { %v404_v53 = vpop.f32.mrf.mxu2  ;;  %v431_v54 = vpop.f32.mrf.mxu3 }
 0x173   : > { %451 = vadd.xlane.f32.xlu1 %v450_v52 }
 0x1e4   : > { %v445_v56 = vpop.xlane.xlu0 %444 }
 0x1e5   : > { %v446_v58 = vadd.f32 %v445_v56, %v443_v55 }
 0x1e6   : > { %v452_v59 = vpop.xlane.xlu1 %451 }
 0x1e7   : > { %448 = vst.msk [vmem:[#allocation4] sm:$0xff] %vm447_vm9, %v446_v58  ;;  %v453_v60 = vadd.f32 %v452_v59, %v449_v57 }
 0x1e9   : > { %454 = vst.msk [vmem:[#allocation5] sm:$0xff] %vm447_vm9, %v453_v60 }
 0x1ea PF: > { %s1265_s1 = sld [smem:[#allocation18_spill]] }
 0x1f0   : > { %p640_p1 = scmp.ne.s32.totalorder %s1265_s1, 1 }
 0x1f1   : > { %s1266_s9 = sld [smem:[#allocation17_spill]] (!%p640_p1) }
 0x1f2   : > { %458 = sbr.rel (%p640_p1) target bundleno = 658 (0x292), region = 60  ;;  %s1267_s18 = sld [smem:[#allocation25_spill]] (!%p640_p1) }
 0x1f3   : > { %s1268_s3 = sld [smem:[#allocation26_spill]] (!%p640_p1) }
 0x1f7   : > { %v459_v61 = vld [vmem:[#allocation4] sm:$0xff]  ;;  %v461_v62 = vld [vmem:[#allocation5] sm:$0xff]  ;;  %v973_v63 = vmov 0   ;;  %s641_s24 = sshll.u32 %s1266_s9, 3 }
 0x1f8   : > { %773 = vset.pattern.permute.xlu0 %v973_v63  ;;  %v460_v0 = vmul.f32 0.0078125, %v459_v61  ;;  %v462_v1 = vmul.f32 0.0078125, %v461_v62  ;;  %v465_v10 = vld [vmem:[%s1267_s18] sm:$0xff]  ;;  %s482_s8 = scalar_lea.vmem [#allocation3], %s641_s24 }
 0x1f9   : > { %v478_v15 = vld [vmem:[%s1268_s3] sm:$0xff] }
 0x1fa   : > { %v463_v2 = vmul.f32 %v460_v0, %v460_v0  ;;  %v483_v18 = vld [vmem:[%s482_s8] sm:$0xff] }
 0x1fc   : > { %v464_v3 = vsub.f32 %v462_v1, %v463_v2 }
 0x1fe   : > { %v466_v4 = vadd.f32 1e-05, %v464_v3 }
 0x200   : > { %774 = vrsqrt.f32 %v466_v4  ;;  %vm473_vm10 = vweird.f32 %v466_v4 }
 0x206   : > { %v775_v5 = vpop.eup %774 }
 0x207   : > { %v468_v6 = vmul.f32 %v775_v5, %v466_v4  ;;  %vm474_vm11 = vweird.f32 %v775_v5 }
 0x208   : > { %vm475_vm12 = vmor %vm473_vm10, %vm474_vm11 }
 0x209   : > { %v469_v7 = vmul.f32 %v775_v5, %v468_v6 }
 0x20b   : > { %v470_v8 = vmul.f32 0.5, %v469_v7 }
 0x20d   : > { %v471_v9 = vsub.f32 1.5, %v470_v8 }
 0x20f   : > { %v472_v11 = vmul.f32 %v775_v5, %v471_v9 }
 0x211   : > { %v476_v12 = vsel %vm475_vm12, %v775_v5, %v472_v11 }
 0x212   : > { %v477_v13 = vmul.f32 %v476_v12, %v465_v10 }
 0x214   : > { %486 = vperm.xlu0 %773, %v477_v13   ;;  %v479_v14 = vmul.f32 %v477_v13, %v460_v0 }
 0x216   : > { %v480_v16 = vsub.f32 %v478_v15, %v479_v14 }
 0x21c   : > { %492 = vperm.xlu0 %773, %v480_v16  }
 0x286   : > { %v487_v17 = vpop.permute.xlu0 %486 }
 0x287   : > { %v489_v19 = vmul.f32 %v487_v17, %v483_v18 }
 0x28e   : > { %v493_v20 = vpop.permute.xlu0 %492 }
 0x28f   : > { %v495_v21 = vadd.f32 %v493_v20, %v489_v19 }
 0x291   : > { %496 = vst [vmem:[%s1148_s25] sm:$0xff] %v495_v21 }
 0x292 PF: > { %s1269_s10 = sld [smem:[#allocation18_spill]]  ;;  %s511_s13 = sshll.u32 %s1148_s25, 4  ;;  %s512_s13 = int_to_ptr.vmem [resolvable:$true] %s511_s13 }
 0x293   : > { %s1270_s6 = sld [smem:[#allocation17_spill]]  ;;  %s498_s5 = scalar_lea.sflag [#allocation8], %s279_s19 }
 0x294   : > { %s1273_s30 = sld [smem:[#allocation27_spill]] }
 0x299   : > { %s505_s14 = smul.u32 %s1270_s6, %s1269_s10 }
 0x29a   : > { %s856_s25 = scalar_lea.hbm %s1273_s30, 16 }
 0x29b   : > { %s643_s15 = sshll.u32 %s505_s14, 3 }
 0x29c   : > { %s509_s1 = scalar_lea.hbm %s1273_s30, %s643_s15 }
 0x29d   : > { %s513_s9 = sshll.u32 %s509_s1, 4  ;;  %s514_s9 = int_to_ptr.hbm [resolvable:$true] %s513_s9 }
 0x29e   : > { %s850_s4 = sshra.s32 %s514_s9, 4  ;;  %s851_s4 = int_to_ptr.hbm [resolvable:$true] %s850_s4 }
 0x29f   : > { %s852_s18 = scalar_lea.hbm %s851_s4, 8  ;;  %p857_p5 = scmp.lt.s32.totalorder %s851_s4, %s1273_s30 }
 0x2a0   : > { %p853_p4 = scmp.ne.s32.totalorder %s851_s4, %s852_s18  ;;  %p858_p7 = scmp.lt.s32.totalorder %s856_s25, %s852_s18 }
 0x2a2   : > { %p854_p2 = pnand %p853_p4, %p1074_p6  ;;  %p859_p8 = por %p858_p7, %p857_p5 }
 0x2a4   : > { %p855_p3 = pneg %p854_p2 }
 0x2a6   : > { %p860_p9 = pnand %p859_p8, %p855_p3 }
 0x2a8   : > { %863 = shalt.err (!%p860_p9)
}
 0x2a9   : > { %656 = dma.vmem_to_hbm [thread:$0]  (%p1074_p6), %s512_s13, 128, %s514_s9, %s498_s5  }
 0x2aa PF: > { %s1274_s19 = sld [smem:[#allocation15_spill]]  ;;  %p673_p12 = scmp.ge.s32.totalorder %s962_s28, 2 }
 0x2ac   : > { %p667_p13 = pnand %p673_p12, %p1080_p10 }
 0x2ae   : > { %p668_p11 = pneg %p667_p13 }
 0x2b0   : > { %s525_s10 = sand.u32 1, %s1274_s19  }
 0x2b1   : > { %s526_s6 = scalar_lea.sflag [#allocation8], %s525_s10 }
 0x2b2   : > { %917 = dma.done.wait (%p668_p11), %s526_s6, 128  }
 0x2b3   : > { %919 = vsyncadd (%p668_p11), %s526_s6, 4294967168  ;;  %s22_s28 = sadd.s32 1, %s962_s28   ;;  %s1276_s18 = sld [smem:[#allocation16_spill]] }
 0x2b4   : > { %p19_p0 = scmp.ge.s32.totalorder %s22_s28, 6   ;;  %s1277_s24 = sld [smem:[#allocation19_spill]] }
 0x2b5   : > { %s1278_s25 = sld [smem:[#allocation20_spill]]  ;;  %s1279_s7 = smov %s1288_s21 }
 0x2b6   : > { %s1280_s19 = smov %s930_s20  ;;  %s1281_s20 = smov %s1122_s27 }
 0x2b7   : > { %s1282_s21 = smov %s938_s22  ;;  %s1283_s22 = smov %s942_s23 }
 0x2b8   : > { %s1284_s23 = smov %s1125_s26  ;;  %s1285_s26 = smov %s1279_s7 }
 0x2b9   : > { %s1286_s27 = smov %s1292_s29  ;;  %21 = sbr.rel (!%p19_p0) target bundleno = 16 (0x10), region = 106 }
 0x2be   :  { %532 = vsyncpa [#allocation7], 1 }
 0x2bf   :  { %534 = vsyncpa [#allocation7 + $0x1], 1 }
 0x2c0   :  { %535 = vsyncpa [#allocation10], 1 }
 0x2c1   :  { %536 = vsyncpa [#allocation8], 1 }
 0x2c2   :  { %538 = vsyncpa [#allocation8 + $0x1], 1 }

</bundles_post_ra>
